<compile_context>
chip_gen: v5e
topology: v5e:2x2
jax: 0.10.0
libtpu: 0.0.40
codegen_flags: <defaults>
</compile_context>

<pallas_src>
import jax
import jax.numpy as jnp
from jax.experimental import pallas as pl
from jax.experimental.pallas import tpu as pltpu


def linear_kernel(x_ref, wb_ref, o_ref):
    # x_ref : (B, IN)
    # wb_ref: (IN + 1, OUT)  -- rows 0..IN-1 are W.T, row IN is the bias
    # o_ref : (B, OUT)
    x = x_ref[...].astype(jnp.float32)
    wb = wb_ref[...].astype(jnp.float32)
    in_features = x.shape[1]

    # Seed the f32 accumulator with the bias row + first MAC term
    # (broadcasts (1,OUT) against (B,1)*(1,OUT) -> (B,OUT)).
    acc = wb[in_features:in_features + 1, :] + x[:, 0:1] * wb[0:1, :]
    # Depth-4 contraction on the VPU: static unroll, IN == 4.
    for k in range(1, in_features):
        acc = acc + x[:, k:k + 1] * wb[k:k + 1, :]

    o_ref[...] = acc.astype(o_ref.dtype)


def prepare_params(weight, bias):
    """One-time parameter prep (NOT in the hot path).

    weight: PyTorch layout (OUT, IN); bias: (OUT,)
    Returns a single fused operand of shape (IN + 1, OUT):
      rows 0..IN-1 = W.T, row IN = bias.
    """
    out_features, in_features = weight.shape
    return jnp.concatenate([weight.T, bias.reshape(1, out_features)], axis=0)


@jax.jit
def linear_pallas(x, wb):
    # x : (B, IN), wb : (IN + 1, OUT) fused weight+bias (pre-laid-out).
    B = x.shape[0]
    out_features = wb.shape[1]
    vmem = pl.BlockSpec(memory_space=pltpu.MemorySpace.VMEM)
    return pl.pallas_call(
        linear_kernel,
        out_shape=jax.ShapeDtypeStruct((B, out_features), x.dtype),
        # No grid: single invocation, whole arrays resident in VMEM.
        in_specs=[vmem, vmem],
        out_specs=vmem,
    )(x, wb)


if __name__ == "__main__":
    key = jax.random.PRNGKey(0)
    kx, kw, kb = jax.random.split(key, 3)

    # Module input: torch.randn(2, 4)
    x = jax.random.normal(kx, (2, 4), dtype=jnp.float32)

    # Deterministic parameter init mimicking nn.Linear(4, 5):
    # weight: (out_features, in_features) = (5, 4), bias: (5,)
    in_features, out_features = 4, 5
    bound = 1.0 / jnp.sqrt(jnp.float32(in_features))
    weight = jax.random.uniform(kw, (out_features, in_features),
                                minval=-bound, maxval=bound, dtype=jnp.float32)
    bias = jax.random.uniform(kb, (out_features,),
                              minval=-bound, maxval=bound, dtype=jnp.float32)

    # One-time layout prep: fused (IN+1, OUT) operand.
    wb = prepare_params(weight, bias)

    y = linear_pallas(x, wb)
    jax.block_until_ready(y)

    # reference check
    y_ref = x @ weight.T + bias
    assert y.shape == (2, 5)
    assert jnp.allclose(y, y_ref, atol=1e-5, rtol=1e-5)

    print("KERNEL_OK")
</pallas_src>

<mosaic_0001>
module attributes {stable_mosaic.version = 11 : i64} {
  func.func @linear_kernel(%arg0: memref<2x4xf32, #tpu.memory_space<vmem>>, %arg1: memref<5x5xf32, #tpu.memory_space<vmem>>, %arg2: memref<2x5xf32, #tpu.memory_space<vmem>>) attributes {dimension_semantics = [], scalar_prefetch = 0 : i64, scratch_operands = 0 : i64, tpu.core_type = #tpu.core_type<tc>} {
    %c0 = arith.constant 0 : index
    %c0_0 = arith.constant 0 : index
    %0 = vector.load %arg0[%c0, %c0_0] : memref<2x4xf32, #tpu.memory_space<vmem>>, vector<2x4xf32>
    %c0_1 = arith.constant 0 : index
    %c0_2 = arith.constant 0 : index
    %1 = vector.load %arg1[%c0_1, %c0_2] : memref<5x5xf32, #tpu.memory_space<vmem>>, vector<5x5xf32>
    %2 = vector.extract_strided_slice %1 {offsets = [4, 0], sizes = [1, 5], strides = [1, 1]} : vector<5x5xf32> to vector<1x5xf32>
    %3 = vector.extract_strided_slice %0 {offsets = [0, 0], sizes = [2, 1], strides = [1, 1]} : vector<2x4xf32> to vector<2x1xf32>
    %4 = vector.extract_strided_slice %1 {offsets = [0, 0], sizes = [1, 5], strides = [1, 1]} : vector<5x5xf32> to vector<1x5xf32>
    %5 = vector.broadcast %3 : vector<2x1xf32> to vector<2x5xf32>
    %6 = vector.broadcast %4 : vector<1x5xf32> to vector<2x5xf32>
    %7 = arith.mulf %5, %6 : vector<2x5xf32>
    %8 = vector.broadcast %2 : vector<1x5xf32> to vector<2x5xf32>
    %9 = arith.addf %8, %7 : vector<2x5xf32>
    %10 = vector.extract_strided_slice %0 {offsets = [0, 1], sizes = [2, 1], strides = [1, 1]} : vector<2x4xf32> to vector<2x1xf32>
    %11 = vector.extract_strided_slice %1 {offsets = [1, 0], sizes = [1, 5], strides = [1, 1]} : vector<5x5xf32> to vector<1x5xf32>
    %12 = vector.broadcast %10 : vector<2x1xf32> to vector<2x5xf32>
    %13 = vector.broadcast %11 : vector<1x5xf32> to vector<2x5xf32>
    %14 = arith.mulf %12, %13 : vector<2x5xf32>
    %15 = arith.addf %9, %14 : vector<2x5xf32>
    %16 = vector.extract_strided_slice %0 {offsets = [0, 2], sizes = [2, 1], strides = [1, 1]} : vector<2x4xf32> to vector<2x1xf32>
    %17 = vector.extract_strided_slice %1 {offsets = [2, 0], sizes = [1, 5], strides = [1, 1]} : vector<5x5xf32> to vector<1x5xf32>
    %18 = vector.broadcast %16 : vector<2x1xf32> to vector<2x5xf32>
    %19 = vector.broadcast %17 : vector<1x5xf32> to vector<2x5xf32>
    %20 = arith.mulf %18, %19 : vector<2x5xf32>
    %21 = arith.addf %15, %20 : vector<2x5xf32>
    %22 = vector.extract_strided_slice %0 {offsets = [0, 3], sizes = [2, 1], strides = [1, 1]} : vector<2x4xf32> to vector<2x1xf32>
    %23 = vector.extract_strided_slice %1 {offsets = [3, 0], sizes = [1, 5], strides = [1, 1]} : vector<5x5xf32> to vector<1x5xf32>
    %24 = vector.broadcast %22 : vector<2x1xf32> to vector<2x5xf32>
    %25 = vector.broadcast %23 : vector<1x5xf32> to vector<2x5xf32>
    %26 = arith.mulf %24, %25 : vector<2x5xf32>
    %27 = arith.addf %21, %26 : vector<2x5xf32>
    %c0_3 = arith.constant 0 : index
    %c0_4 = arith.constant 0 : index
    %28 = vector.load %arg2[%c0_3, %c0_4] : memref<2x5xf32, #tpu.memory_space<vmem>>, vector<2x5xf32>
    tpu.vector_store %arg2[%c0_3, %c0_4], %27 {strides = array<i32>} : memref<2x5xf32, #tpu.memory_space<vmem>>, vector<2x5xf32>,
    return
  }
}

</mosaic_0001>

<bundles_post_ra>
// kernel: linear_pallas.1
= control target key start
LH: loop header
LB: loop body
LE: loop exit
PB: predicated region body
PF: predicated region fallthrough
CT: control target
= control target key end

     0   :  { %7 = vsyncpa [#allocation3], 0  ;;  %s213_s0 = inlined_call_operand.hbm [shape: f32[2,4], index: 0, kind: input, shape index: {}]   ;;  %s214_s1 = inlined_call_operand.hbm [shape: f32[5,5], index: 1, kind: input, shape index: {}]   ;;  %s215_s2 = inlined_call_operand.hbm [shape: f32[2,5], index: 2, kind: output, shape index: {}]  }
   0x1   :  { %8 = vsyncpa [#allocation6], 0 }
   0x2   :  { %9 = vsyncpa [#allocation4], 0  ;;  %s15_s11 = sshll.u32 %s213_s0, 4  ;;  %s182_s12 = smov [#allocation2]   ;;  %s16_s11 = int_to_ptr.hbm [resolvable:$true] %s15_s11 }
   0x3   :  { %s17_s13 = sshll.u32 %s182_s12, 4  ;;  %s26_s16 = sshll.u32 %s214_s1, 4  ;;  %s18_s13 = int_to_ptr.vmem [resolvable:$true] %s17_s13  ;;  %s27_s16 = int_to_ptr.hbm [resolvable:$true] %s26_s16 }
   0x4   :  { %20 = dma.hbm_to_vmem [thread:$0]  %s16_s11, 32, %s18_s13, [#allocation3]  }
   0x5   :  { %s183_s17 = smov [#allocation5]  }
   0x6   :  { %s28_s18 = sshll.u32 %s183_s17, 4  ;;  %s29_s18 = int_to_ptr.vmem [resolvable:$true] %s28_s18 }
   0x7   :  { %31 = dma.hbm_to_vmem [thread:$0]  %s27_s16, 128, %s29_s18, [#allocation6]  }
   0x8   :  { %176 = dma.done.wait [#allocation3], 32  }
   0x9   :  { %177 = vsyncadd [#allocation3], 4294967264 }
   0xa   :  { %178 = dma.done.wait [#allocation6], 128  }
   0xb   :  { %179 = vsyncadd [#allocation6], 4294967168  ;;  %v184_v0 = vmov 0   ;;  %v185_v1 = vmov 2   ;;  %v40_v2 = vld [vmem:[#allocation2] sm:$0x3] }
   0xc   :  { %99 = vset.pattern.permute.xlu0 %v184_v0  ;;  %101 = vset.pattern.permute.xlu1 %v185_v1  ;;  %v186_v3 = vmov 1   ;;  %v187_v4 = vmov 3   ;;  %v41_v5 = vld [vmem:[#allocation5] sm:$0x1f]  ;;  %s188_s0 = smov [#allocation7]   ;;  %s81_s21 = sshll.u32 %s215_s2, 4  ;;  %s82_s21 = int_to_ptr.hbm [resolvable:$true] %s81_s21 }
   0xd   :  { %44 = vperm.xlu0 %99, %v40_v2   ;;  %59 = vperm.xlu1 %101, %v40_v2   ;;  %v47_v8 = vperm.slane %v41_v5, 0  ;;  %v49_v9 = vperm.slane %v41_v5, 4  ;;  %v55_v11 = vperm.slane %v41_v5, 1  ;;  %v62_v12 = vperm.slane %v41_v5, 2  ;;  %s79_s1 = sshll.u32 %s188_s0, 4  ;;  %s80_s1 = int_to_ptr.vmem [resolvable:$true] %s79_s1 }
   0xe   :  { %v69_v13 = vperm.slane %v41_v5, 3  ;;  %vm72_vm0 = vcmask 33792  }
  0x15   :  { %100 = vset.pattern.permute.xlu0 %v186_v3  ;;  %102 = vset.pattern.permute.xlu1 %v187_v4 }
  0x16   :  { %52 = vperm.xlu0 %100, %v40_v2   ;;  %66 = vperm.xlu1 %102, %v40_v2  }
  0x1e   :  { %103 = vset.pattern.permute.xlu0 %v187_v4 }
  0x7f   :  { %v45_v6 = vpop.permute.xlu0 %44  ;;  %v60_v7 = vpop.permute.xlu1 %59 }
  0x80   :  { %v48_v10 = vmul.f32 %v47_v8, %v45_v6  ;;  %v63_v18 = vmul.f32 %v62_v12, %v60_v7 }
  0x82   :  { %v50_v16 = vadd.f32 %v49_v9, %v48_v10 }
  0x88   :  { %v53_v14 = vpop.permute.xlu0 %52  ;;  %v67_v15 = vpop.permute.xlu1 %66 }
  0x89   :  { %v56_v17 = vmul.f32 %v55_v11, %v53_v14  ;;  %v70_v20 = vmul.f32 %v69_v13, %v67_v15 }
  0x8b   :  { %v57_v19 = vadd.f32 %v56_v17, %v50_v16 }
  0x8d   :  { %v64_v21 = vadd.f32 %v63_v18, %v57_v19 }
  0x8f   :  { %v71_v22 = vadd.f32 %v70_v20, %v64_v21 }
  0x91   :  { %73 = vst.msk [vmem:[#allocation7] sm:$0x3] %vm72_vm0, %v71_v22 }
  0x92   :  { %84 = dma.vmem_to_hbm [thread:$0]  %s80_s1, 32, %s82_s21, [#allocation4]  }
  0x93   :  { %180 = dma.done.wait [#allocation4], 32  }
  0x94   :  { %181 = vsyncadd [#allocation4], 4294967264 }
  0x95   :  { %89 = vsyncpa [#allocation3], 1 }
  0x96   :  { %90 = vsyncpa [#allocation6], 1 }
  0x97   :  { %91 = vsyncpa [#allocation4], 1 }

</bundles_post_ra>
